<compile_context>
chip_gen: v7x
topology: tpu7x:2x2x1
jax: 0.10.0
libtpu: 0.0.40
codegen_flags: <defaults>
</compile_context>

<pallas_src>
import functools
import math

import jax
import jax.numpy as jnp
from jax.experimental import pallas as pl
from jax.experimental.pallas import tpu as pltpu


# ------------------------------ VMEM budget ----------------------------------

def _detect_vmem_budget():
    """Per-generation VMEM limit (3/4 of physical, capped)."""
    cap = None
    try:
        info = pltpu.get_tpu_info()
        cap = getattr(info, "vmem_capacity_bytes", None)
    except Exception:
        cap = None
    if not cap or cap <= 0:
        cap = 64 * 1024 * 1024          # conservative default (v7x-sized)
    return min(int(cap * 3 // 4), 100 * 1024 * 1024)


_VMEM_LIMIT = _detect_vmem_budget()


# ------------------------------ tile selection --------------------------------

def _pick_tile(dim, target, base):
    """Largest tile <= target that is a multiple of `base` and divides `dim`;
    falls back to the full dim (which always satisfies the (8,128) rule)."""
    if dim <= target:
        return dim
    t = (target // base) * base
    while t >= base:
        if dim % t == 0:
            return t
        t -= base
    return dim


def _row_tile(M, target):
    """Token-dim tile: multiple of 8; callers pad rows up to a multiple of it
    (avoids the giant-single-block fallback for awkward token counts)."""
    if M <= target:
        return max(8, ((M + 7) // 8) * 8)
    return max(8, (target // 8) * 8)


def _pad_rows(x, mult):
    pad = (-x.shape[0]) % mult
    if pad:
        x = jnp.pad(x, ((0, pad), (0, 0)))
    return x


# ----------------------------- RMSNorm kernels --------------------------------

def _rmsnorm_kernel(x_ref, w_ref, o_ref, *, eps):
    x = x_ref[...].astype(jnp.float32)
    var = jnp.mean(x * x, axis=-1, keepdims=True)
    o_ref[...] = (x * jax.lax.rsqrt(var + eps) * w_ref[...]).astype(o_ref.dtype)


def rmsnorm(x, w, eps=1e-5, *, bm=256):
    M, H = x.shape
    bm = _row_tile(M, bm)
    xp = _pad_rows(x, bm)
    Mp = xp.shape[0]
    out = pl.pallas_call(
        functools.partial(_rmsnorm_kernel, eps=eps),
        grid=(Mp // bm,),
        in_specs=[pl.BlockSpec((bm, H), lambda i: (i, 0)),
                  pl.BlockSpec((1, H), lambda i: (0, 0))],
        out_specs=pl.BlockSpec((bm, H), lambda i: (i, 0)),
        out_shape=jax.ShapeDtypeStruct((Mp, H), x.dtype),
        compiler_params=pltpu.CompilerParams(
            dimension_semantics=("parallel",),
            vmem_limit_bytes=_VMEM_LIMIT),
    )(xp, w.reshape(1, H))
    return out[:M] if Mp != M else out


def _add_rmsnorm_kernel(x_ref, r_ref, w_ref, o_ref, res_ref, *, eps):
    x = x_ref[...].astype(jnp.float32) + r_ref[...].astype(jnp.float32)
    res_ref[...] = x.astype(res_ref.dtype)
    var = jnp.mean(x * x, axis=-1, keepdims=True)
    o_ref[...] = (x * jax.lax.rsqrt(var + eps) * w_ref[...]).astype(o_ref.dtype)


def add_rmsnorm(x, residual, w, eps=1e-5, *, bm=256):
    M, H = x.shape
    bm = _row_tile(M, bm)
    xp = _pad_rows(x, bm)
    rp = _pad_rows(residual, bm)
    Mp = xp.shape[0]
    out, res = pl.pallas_call(
        functools.partial(_add_rmsnorm_kernel, eps=eps),
        grid=(Mp // bm,),
        in_specs=[pl.BlockSpec((bm, H), lambda i: (i, 0)),
                  pl.BlockSpec((bm, H), lambda i: (i, 0)),
                  pl.BlockSpec((1, H), lambda i: (0, 0))],
        out_specs=(pl.BlockSpec((bm, H), lambda i: (i, 0)),
                   pl.BlockSpec((bm, H), lambda i: (i, 0))),
        out_shape=(jax.ShapeDtypeStruct((Mp, H), x.dtype),
                   jax.ShapeDtypeStruct((Mp, H), x.dtype)),
        compiler_params=pltpu.CompilerParams(
            dimension_semantics=("parallel",),
            vmem_limit_bytes=_VMEM_LIMIT),
    )(xp, rp, w.reshape(1, H))
    if Mp != M:
        out, res = out[:M], res[:M]
    return out, res


# ------------------------------ Linear kernels ---------------------------------

def _matmul_kernel(x_ref, w_ref, o_ref, acc_ref):
    @pl.when(pl.program_id(2) == 0)
    def _():
        acc_ref[...] = jnp.zeros_like(acc_ref)

    acc_ref[...] += jnp.dot(x_ref[...], w_ref[...],
                            preferred_element_type=jnp.float32)

    @pl.when(pl.program_id(2) == pl.num_programs(2) - 1)
    def _():
        o_ref[...] = acc_ref[...].astype(o_ref.dtype)


def _matmul_bias_kernel(x_ref, w_ref, b_ref, o_ref, acc_ref):
    @pl.when(pl.program_id(2) == 0)
    def _():
        acc_ref[...] = jnp.zeros_like(acc_ref)

    acc_ref[...] += jnp.dot(x_ref[...], w_ref[...],
                            preferred_element_type=jnp.float32)

    @pl.when(pl.program_id(2) == pl.num_programs(2) - 1)
    def _():
        o_ref[...] = (acc_ref[...] + b_ref[...]).astype(o_ref.dtype)


def linear(x, w, b=None, *, tm=512, tn=256, tk=512):
    """Tiled (tm, tn, tk) matmul with f32 VMEM accumulator over the K axis.
    Larger tm amortizes weight HBM streaming (weight traffic ~ M/tm * K*N)."""
    M, K = x.shape
    _, N = w.shape
    tm = _row_tile(M, tm)
    tn = _pick_tile(N, tn, 128)
    tk = _pick_tile(K, tk, 128)
    xp = _pad_rows(x, tm)
    Mp = xp.shape[0]

    # keep a non-degenerate "parallel" axis so v7x's two TensorCores both get
    # work when the token axis collapses to a single block
    if Mp // tm == 1 and N // tn == 1 and N // 2 >= 128 and (N // 2) % 128 == 0:
        tn = N // 2

    grid = (Mp // tm, N // tn, K // tk)

    in_specs = [pl.BlockSpec((tm, tk), lambda i, j, k: (i, k)),
                pl.BlockSpec((tk, tn), lambda i, j, k: (k, j))]
    args = [xp, w]
    kernel = _matmul_kernel
    if b is not None:
        kernel = _matmul_bias_kernel
        in_specs.append(pl.BlockSpec((1, tn), lambda i, j, k: (0, j)))
        args.append(b.reshape(1, N))

    out = pl.pallas_call(
        kernel,
        grid=grid,
        in_specs=in_specs,
        out_specs=pl.BlockSpec((tm, tn), lambda i, j, k: (i, j)),
        out_shape=jax.ShapeDtypeStruct((Mp, N), x.dtype),
        scratch_shapes=[pltpu.VMEM((tm, tn), jnp.float32)],
        compiler_params=pltpu.CompilerParams(
            dimension_semantics=("parallel", "parallel", "arbitrary"),
            vmem_limit_bytes=_VMEM_LIMIT),
    )(*args)
    return out[:M] if Mp != M else out


# ------------------------------ Fused MLP kernel --------------------------------

def _mlp_kernel(x_ref, wg_ref, wu_ref, wd_ref, o_ref, acc_ref):
    fi = pl.program_id(1)

    @pl.when(fi == 0)
    def _():
        acc_ref[...] = jnp.zeros_like(acc_ref)

    x = x_ref[...]
    gate = jnp.dot(x, wg_ref[...], preferred_element_type=jnp.float32)
    up = jnp.dot(x, wu_ref[...], preferred_element_type=jnp.float32)
    act = gate * jax.nn.sigmoid(gate) * up          # SiluAndMul, f32 on VPU/EUP
    acc_ref[...] += jnp.dot(act.astype(x.dtype), wd_ref[...],
                            preferred_element_type=jnp.float32)

    @pl.when(fi == pl.num_programs(1) - 1)
    def _():
        o_ref[...] = acc_ref[...].astype(o_ref.dtype)


def mlp(x, w_gate_up, w_down, *, tm=None, tf=256):
    """gate/up matmul + SiLU*up + accumulated down-projection, tiled over ffn.

    tm is chosen against the per-generation VMEM budget (v7x 64 MiB physical
    gets a smaller tm than v5e/v6e 128 MiB) -- weight HBM traffic scales with
    M/tm so this is the main MLP lever at prefill.

    The merged (H, 2F) gate/up weight is read in-place: gate half at block
    column f, up half at block column f + F//tf.
    # TODO(synk): pre-interleave w_gate_up at weight-load time so gate/up tiles
    #             are one contiguous (H, 2*tf) DMA stream.
    # TODO(synk): fp8 weight-only quantization on v7x for another ~2x on weight
    #             HBM traffic.
    """
    M, H = x.shape
    F = w_down.shape[0]
    assert w_gate_up.shape == (H, 2 * F)
    tf = _pick_tile(F, tf, 128)
    nf = F // tf
    itemsize = jnp.dtype(x.dtype).itemsize

    if tm is None:
        budget = int(_VMEM_LIMIT * 0.85)
        tm = 64
        for cand in (1024, 768, 512, 384, 256, 128, 64):
            # double-buffered x/gate/up/down/out tiles + f32 accumulator
            est = 2 * itemsize * (2 * cand * H + 3 * H * tf) + 4 * cand * H
            if est <= budget:
                tm = cand
                break
    tm = _row_tile(M, tm)
    xp = _pad_rows(x, tm)
    Mp = xp.shape[0]

    out = pl.pallas_call(
        _mlp_kernel,
        grid=(Mp // tm, nf),
        in_specs=[
            pl.BlockSpec((tm, H), lambda i, f: (i, 0)),
            pl.BlockSpec((H, tf), lambda i, f: (0, f)),        # gate half
            pl.BlockSpec((H, tf), lambda i, f: (0, f + nf)),   # up half
            pl.BlockSpec((tf, H), lambda i, f: (f, 0)),
        ],
        out_specs=pl.BlockSpec((tm, H), lambda i, f: (i, 0)),
        out_shape=jax.ShapeDtypeStruct((Mp, H), x.dtype),
        scratch_shapes=[pltpu.VMEM((tm, H), jnp.float32)],
        compiler_params=pltpu.CompilerParams(
            dimension_semantics=("parallel", "arbitrary"),
            vmem_limit_bytes=_VMEM_LIMIT),
    )(xp, w_gate_up, w_gate_up, w_down)
    return out[:M] if Mp != M else out


# ------------------------------- RoPE kernel -------------------------------------

def _rope_kernel(x_ref, cos_ref, sin_ref, o_ref):
    """ChatGLM interleaved RoPE on one (rows, head_dim) tile.

    out[2j]   = x[2j]*c[j] - x[2j+1]*s[j]
    out[2j+1] = x[2j+1]*c[j] + x[2j]*s[j]    (for 2j < head_dim/2, identity after)
    cos_ref / sin_ref are pre-expanded full-width tables (sin carries the signs
    and zeros), so the kernel is x*cos + pair_swap(x)*sin.
    """
    x = x_ref[...].astype(jnp.float32)
    hd = x.shape[-1]
    # pair-swap adjacent lanes (x[2j] <-> x[2j+1]) with a tiny permutation
    # matmul -- exact, and the MXU is idle in this mem-bound kernel.
    # TODO(synk): replace with pltpu.roll lane rotates / fuse into the attention
    #             kernel's Q/K load path to drop this HBM round trip entirely.
    row = jax.lax.broadcasted_iota(jnp.int32, (hd, hd), 0)
    col = jax.lax.broadcasted_iota(jnp.int32, (hd, hd), 1)
    partner = row + 1 - 2 * (row % 2)          # i+1 if i even else i-1
    perm = (partner == col).astype(jnp.float32)
    swapped = jnp.dot(x, perm, preferred_element_type=jnp.float32)
    o_ref[...] = (x * cos_ref[...] + swapped * sin_ref[...]).astype(o_ref.dtype)


def rope_heads_from(x, cos_full, sin_full, *, head_offset, num_heads, head_dim,
                    bm=512):
    """Apply RoPE to `num_heads` heads read directly out of the flat projection
    output `x` (block columns starting at `head_offset`); returns (S, num_heads*hd)."""
    S = x.shape[0]
    bm = _pick_tile(S, bm, 8)
    return pl.pallas_call(
        _rope_kernel,
        grid=(S // bm, num_heads),
        in_specs=[pl.BlockSpec((bm, head_dim), lambda i, h: (i, head_offset + h)),
                  pl.BlockSpec((bm, head_dim), lambda i, h: (i, 0)),
                  pl.BlockSpec((bm, head_dim), lambda i, h: (i, 0))],
        out_specs=pl.BlockSpec((bm, head_dim), lambda i, h: (i, h)),
        out_shape=jax.ShapeDtypeStruct((S, num_heads * head_dim), x.dtype),
        compiler_params=pltpu.CompilerParams(
            dimension_semantics=("parallel", "parallel"),
            vmem_limit_bytes=_VMEM_LIMIT),
    )(x, cos_full, sin_full)


def _expand_rope_tables(cos, sin, head_dim):
    """Expand (S, hd/2) rotate-half tables to full-width (S, hd) interleaved
    tables (sin carries the alternating sign and zeros for the non-rope half)."""
    cos = cos.astype(jnp.float32)
    sin = sin.astype(jnp.float32)
    S, rd = cos.shape
    assert rd * 2 == head_dim
    half = rd // 2
    c = cos[:, :half]
    s = sin[:, :half]
    c_i = jnp.stack([c, c], axis=-1).reshape(S, rd)
    s_i = jnp.stack([-s, s], axis=-1).reshape(S, rd)
    cos_full = jnp.concatenate([c_i, jnp.ones((S, head_dim - rd), jnp.float32)],
                               axis=-1)
    sin_full = jnp.concatenate([s_i, jnp.zeros((S, head_dim - rd), jnp.float32)],
                               axis=-1)
    return cos_full, sin_full


# -------------------------- Flash attention kernel --------------------------------

def _flash_attn_kernel(q_ref, k_ref, v_ref, o_ref, m_ref, l_ref, acc_ref, *, scale):
    qi = pl.program_id(1)
    ki = pl.program_id(2)
    nk = pl.num_programs(2)
    flat = len(q_ref.shape) == 2
    tq = q_ref.shape[0] if flat else q_ref.shape[1]
    tk = k_ref.shape[0] if flat else k_ref.shape[1]

    @pl.when(ki == 0)
    def _():
        m_ref[...] = jnp.full_like(m_ref, -1e30)
        l_ref[...] = jnp.zeros_like(l_ref)
        acc_ref[...] = jnp.zeros_like(acc_ref)

    q_start = qi * tq
    k_start = ki * tk

    def compute(masked):
        q = q_ref[...] if flat else q_ref[0]
        k = k_ref[...] if flat else k_ref[0]
        v = v_ref[...] if flat else v_ref[0]
        s = jax.lax.dot_general(q, k, (((1,), (1,)), ((), ())),
                                preferred_element_type=jnp.float32) * scale
        if masked:
            row = q_start + jax.lax.broadcasted_iota(jnp.int32, (tq, tk), 0)
            col = k_start + jax.lax.broadcasted_iota(jnp.int32, (tq, tk), 1)
            mask = row >= col
            s = jnp.where(mask, s, -1e30)
        m_prev = m_ref[...]
        m_new = jnp.maximum(m_prev, jnp.max(s, axis=-1, keepdims=True))
        p = jnp.exp(s - m_new)
        if masked:
            p = jnp.where(mask, p, 0.0)
        alpha = jnp.exp(m_prev - m_new)
        l_ref[...] = alpha * l_ref[...] + jnp.sum(p, axis=-1, keepdims=True)
        acc_ref[...] = alpha * acc_ref[...] + jnp.dot(
            p.astype(v.dtype), v, preferred_element_type=jnp.float32)
        m_ref[...] = m_new

    # Tile fully below the causal diagonal -> no iota/compare/select needed.
    interior = k_start + tk <= q_start + 1
    # Tile crossing the diagonal -> masked update. Tiles fully above the
    # diagonal do nothing (their KV DMA is also skipped via the clamped index_map).
    diagonal = jnp.logical_and(k_start <= q_start + tq - 1,
                               jnp.logical_not(interior))

    pl.when(interior)(lambda: compute(False))
    pl.when(diagonal)(lambda: compute(True))

    @pl.when(ki == nk - 1)
    def _():
        # exact divide (not pl.reciprocal approx) to keep tight numerics vs ref
        o_ref[...] = (acc_ref[...] / l_ref[...]).astype(o_ref.dtype)


def _flash_scratch(tq, D):
    return [pltpu.VMEM((tq, 1), jnp.float32),   # running max
            pltpu.VMEM((tq, 1), jnp.float32),   # running denom
            pltpu.VMEM((tq, D), jnp.float32)]   # output accumulator


def flash_attention_flat(q, k, qkv, *, scale, num_kv_heads, head_dim,
                         v_head_offset, tq=256, tk=256):
    """Causal GQA flash attention on flat lane-dense layouts.

    q: (S, Hq*D) roped queries; k: (S, Hkv*D) roped keys; V is read directly
    out of the QKV slab at block-column offset `v_head_offset` (no split).
    KV index_map is clamped to the last tile under the causal diagonal so the
    ~half of grid steps with no compute also issue no KV DMA.
    Output is lane-dense (S, Hq*D).
    """
    S, qw = q.shape
    D = head_dim
    Hq = qw // D
    rep = Hq // num_kv_heads
    tq = _pick_tile(S, tq, 8)
    tk = _pick_tile(S, tk, 8)
    grid = (Hq, S // tq, S // tk)

    def kv_block(ki, qi):
        last = ((qi + 1) * tq - 1) // tk
        return jnp.minimum(ki, last)

    return pl.pallas_call(
        functools.partial(_flash_attn_kernel, scale=scale),
        grid=grid,
        in_specs=[
            pl.BlockSpec((tq, D), lambda h, qi, ki: (qi, h)),
            pl.BlockSpec((tk, D), lambda h, qi, ki: (kv_block(ki, qi), h // rep)),
            pl.BlockSpec((tk, D),
                         lambda h, qi, ki: (kv_block(ki, qi),
                                            v_head_offset + h // rep)),
        ],
        out_specs=pl.BlockSpec((tq, D), lambda h, qi, ki: (qi, h)),
        out_shape=jax.ShapeDtypeStruct((S, Hq * D), q.dtype),
        scratch_shapes=_flash_scratch(tq, D),
        compiler_params=pltpu.CompilerParams(
            dimension_semantics=("parallel", "parallel", "arbitrary"),
            vmem_limit_bytes=_VMEM_LIMIT),
    )(q, k, qkv)


def flash_attention_heads(q, k, v, *, scale, tq=256, tk=256):
    """Fallback causal GQA attention on (H, S, D) layout for small head dims.
    # TODO(synk): ragged S (non multiple-of-8) not handled in attention tiling."""
    Hq, S, D = q.shape
    Hkv = k.shape[0]
    rep = Hq // Hkv
    tq = _pick_tile(S, tq, 8)
    tk = _pick_tile(S, tk, 8)
    nq_tiles = S // tq
    grid = (Hq, nq_tiles, S // tk)

    def kv_block(ki, qi):
        last = ((qi + 1) * tq - 1) // tk
        return jnp.minimum(ki, last)

    out = pl.pallas_call(
        functools.partial(_flash_attn_kernel, scale=scale),
        grid=grid,
        in_specs=[
            pl.BlockSpec((1, tq, D), lambda h, qi, ki: (h, qi, 0)),
            pl.BlockSpec((1, tk, D),
                         lambda h, qi, ki: (h // rep, kv_block(ki, qi), 0)),
            pl.BlockSpec((1, tk, D),
                         lambda h, qi, ki: (h // rep, kv_block(ki, qi), 0)),
        ],
        out_specs=pl.BlockSpec((tq, D),
                               lambda h, qi, ki: (h * nq_tiles + qi, 0)),
        out_shape=jax.ShapeDtypeStruct((Hq * S, D), q.dtype),
        scratch_shapes=_flash_scratch(tq, D),
        compiler_params=pltpu.CompilerParams(
            dimension_semantics=("parallel", "parallel", "arbitrary"),
            vmem_limit_bytes=_VMEM_LIMIT),
    )(q, k, v)
    return out.reshape(Hq, S, D).transpose(1, 0, 2).reshape(S, Hq * D)


# ----------------------------- JAX glue (fallback RoPE) ----------------------------

def extract_rope(x):
    """First half of head_dim, deinterleaved (ChatGLM pair layout -> rotate-half)."""
    hd = x.shape[-1]
    half = x[..., : hd // 2]
    s = half.shape
    r = half.reshape(*s[:-1], -1, 2)
    r = jnp.swapaxes(r, -2, -1)
    return r.reshape(*s)


def fill_rope(x, rope):
    """Re-interleave the rotated rope part back into the first half of head_dim."""
    hd = x.shape[-1]
    s = rope.shape
    r = rope.reshape(*s[:-1], 2, -1)
    r = jnp.swapaxes(r, -2, -1).reshape(*s)
    return jnp.concatenate([r, x[..., hd // 2:]], axis=-1)


def _rope_jax(x, cos, sin):
    """ChatGLM RoPE on (S, n_heads, hd) -- used only for the small-head fallback path."""
    r = extract_rope(x)
    half = r.shape[-1] // 2
    rot = jnp.concatenate([-r[..., half:], r[..., :half]], axis=-1)
    r = r * cos[:, None, :] + rot * sin[:, None, :]
    return fill_rope(x, r)


def glm_block(hidden_states, cos, sin, params, cfg):
    """GLMBlock.forward with residual=None; returns (mlp_output, residual)."""
    nq, nkv, hd = cfg['num_heads'], cfg['num_kv_heads'], cfg['head_size']
    eps = cfg['eps']
    tq = cfg.get('attn_tq', 256)
    tk = cfg.get('attn_tk', 256)
    S, H = hidden_states.shape
    scale = 1.0 / math.sqrt(hd)

    residual = hidden_states
    ln_out = rmsnorm(hidden_states, params['input_ln_w'], eps)

    # --- self attention ---
    qkv = linear(ln_out, params['w_qkv'], params['b_qkv'])      # add_qkv_bias=True

    if hd % 128 == 0:
        # flat, lane-dense path: RoPE in Pallas straight off the QKV slab; V is
        # read out of qkv inside the attention kernel (no split / transposes).
        cos_f, sin_f = _expand_rope_tables(cos, sin, hd)
        q_r = rope_heads_from(qkv, cos_f, sin_f,
                              head_offset=0, num_heads=nq, head_dim=hd)
        k_r = rope_heads_from(qkv, cos_f, sin_f,
                              head_offset=nq, num_heads=nkv, head_dim=hd)
        attn = flash_attention_flat(q_r, k_r, qkv, scale=scale,
                                    num_kv_heads=nkv, head_dim=hd,
                                    v_head_offset=nq + nkv, tq=tq, tk=tk)
    else:
        # small-head fallback (toy shapes): split + JAX RoPE + per-head layout
        q, k, v = jnp.split(qkv, [nq * hd, (nq + nkv) * hd], axis=-1)
        q = _rope_jax(q.reshape(S, nq, hd), cos, sin)
        k = _rope_jax(k.reshape(S, nkv, hd), cos, sin)
        v = v.reshape(S, nkv, hd)
        attn = flash_attention_heads(q.transpose(1, 0, 2), k.transpose(1, 0, 2),
                                     v.transpose(1, 0, 2), scale=scale,
                                     tq=tq, tk=tk)

    # TODO(synk): paged KV cache / attn_metadata (past_key_value) not modeled;
    #             this is the prefill path (causal attention over current tokens).
    attn_out = linear(attn, params['w_o'], None)                # add_bias_linear=False

    # --- post attention norm + MLP ---
    ln_out2, residual = add_rmsnorm(attn_out, residual, params['post_ln_w'], eps)
    mlp_out = mlp(ln_out2, params['w_gate_up'], params['w_down'])
    return mlp_out, residual


# --------------------------- pure-JAX reference ------------------------------------

def glm_block_ref(hidden_states, cos, sin, params, cfg):
    nq, nkv, hd = cfg['num_heads'], cfg['num_kv_heads'], cfg['head_size']
    eps = cfg['eps']
    S, H = hidden_states.shape

    def rms(x, w):
        var = jnp.mean(x * x, axis=-1, keepdims=True)
        return x * jax.lax.rsqrt(var + eps) * w

    residual = hidden_states
    ln_out = rms(hidden_states, params['input_ln_w'])
    qkv = ln_out @ params['w_qkv'] + params['b_qkv']
    q, k, v = jnp.split(qkv, [nq * hd, (nq + nkv) * hd], axis=-1)
    q = q.reshape(S, nq, hd)
    k = k.reshape(S, nkv, hd)
    v = v.reshape(S, nkv, hd)

    def rope(x):
        d = x.shape[-1] // 2
        rot = jnp.concatenate([-x[..., d:], x[..., :d]], axis=-1)
        return x * cos[:, None, :] + rot * sin[:, None, :]

    q = fill_rope(q, rope(extract_rope(q)))
    k = fill_rope(k, rope(extract_rope(k)))
    rep = nq // nkv
    qh = q.transpose(1, 0, 2)
    kh = jnp.repeat(k, rep, axis=1).transpose(1, 0, 2)
    vh = jnp.repeat(v, rep, axis=1).transpose(1, 0, 2)
    s = jnp.einsum('hqd,hkd->hqk', qh, kh) / math.sqrt(hd)
    mask = jnp.tril(jnp.ones((S, S), bool))
    s = jnp.where(mask[None], s, -1e30)
    p = jax.nn.softmax(s, axis=-1)
    attn = jnp.einsum('hqk,hkd->hqd', p, vh).transpose(1, 0, 2).reshape(S, nq * hd)
    attn_out = attn @ params['w_o']

    x = attn_out + residual
    residual = x
    ln2 = rms(x, params['post_ln_w'])
    gu = ln2 @ params['w_gate_up']
    ffn = params['w_down'].shape[0]
    gate, up = gu[:, :ffn], gu[:, ffn:]
    mlp_out = (gate * jax.nn.sigmoid(gate) * up) @ params['w_down']
    return mlp_out, residual


# ------------------------------------ main ------------------------------------------

def _make_case(cfg, key, wscale, dtype):
    H, nq, nkv, hd, F, S = (cfg['hidden'], cfg['num_heads'], cfg['num_kv_heads'],
                            cfg['head_size'], cfg['ffn'], cfg['seq'])
    keys = jax.random.split(key, 8)
    params = dict(
        input_ln_w=jnp.ones((H,), dtype),
        post_ln_w=jnp.ones((H,), dtype),
        w_qkv=(jax.random.normal(keys[0], (H, (nq + 2 * nkv) * hd), jnp.float32)
               * wscale).astype(dtype),
        b_qkv=(jax.random.normal(keys[1], ((nq + 2 * nkv) * hd,), jnp.float32)
               * wscale).astype(dtype),
        w_o=(jax.random.normal(keys[2], (nq * hd, H), jnp.float32)
             * wscale).astype(dtype),
        w_gate_up=(jax.random.normal(keys[3], (H, 2 * F), jnp.float32)
                   * wscale).astype(dtype),
        w_down=(jax.random.normal(keys[4], (F, H), jnp.float32)
                * wscale).astype(dtype),
    )
    hidden = jax.random.normal(keys[5], (S, H), jnp.float32).astype(dtype)

    # rotary tables: rope_dim = head_size // 2, rotate-half (concatenated) layout
    rd = hd // 2
    inv_freq = 1.0 / (10000.0 ** (jnp.arange(0, rd, 2, dtype=jnp.float32) / rd))
    pos = jnp.arange(S, dtype=jnp.float32)
    freqs = pos[:, None] * inv_freq[None, :]
    cos = jnp.concatenate([jnp.cos(freqs), jnp.cos(freqs)], axis=-1)
    sin = jnp.concatenate([jnp.sin(freqs), jnp.sin(freqs)], axis=-1)
    return params, hidden, cos, sin


def _max_rel(a, b):
    a = jnp.asarray(a, jnp.float32)
    b = jnp.asarray(b, jnp.float32)
    return float(jnp.max(jnp.abs(a - b)) / (jnp.max(jnp.abs(b)) + 1e-6))


if __name__ == "__main__":
    # ---- toy f32 case: exercises the small-head fallback (3D) attention path ----
    cfg1 = dict(hidden=32, num_heads=4, num_kv_heads=2, head_size=8, ffn=64,
                eps=1e-5, seq=8)
    p1, h1, c1, s1 = _make_case(cfg1, jax.random.PRNGKey(0), 0.05, jnp.float32)
    out1, res1 = glm_block(h1, c1, s1, p1, cfg1)
    jax.block_until_ready((out1, res1))
    ro1, rr1 = glm_block_ref(h1, c1, s1, p1, cfg1)
    assert out1.shape == (cfg1['seq'], cfg1['hidden'])
    assert res1.shape == (cfg1['seq'], cfg1['hidden'])
    assert jnp.allclose(out1, ro1, atol=1e-4, rtol=1e-4)
    assert jnp.allclose(res1, rr1, atol=1e-4, rtol=1e-4)

    # ---- medium f32 case: exercises the flat lane-dense path, Pallas RoPE,
    #      causal tile skip + clamped KV DMA, GQA dedup, multi k-tile streaming ----
    cfg2 = dict(hidden=256, num_heads=2, num_kv_heads=1, head_size=128, ffn=512,
                eps=1e-5, seq=256, attn_tq=128, attn_tk=128)
    p2, h2, c2, s2 = _make_case(cfg2, jax.random.PRNGKey(0), 0.02, jnp.float32)
    out2, res2 = glm_block(h2, c2, s2, p2, cfg2)
    jax.block_until_ready((out2, res2))
    ro2, rr2 = glm_block_ref(h2, c2, s2, p2, cfg2)
    assert out2.shape == (cfg2['seq'], cfg2['hidden'])
    assert _max_rel(out2, ro2) < 2e-2, _max_rel(out2, ro2)
    assert _max_rel(res2, rr2) < 2e-2, _max_rel(res2, rr2)

    # ---- medium bf16 case: bf16 operands / f32 accumulation through the same path ----
    p3 = {k: v.astype(jnp.bfloat16) for k, v in p2.items()}
    h3 = h2.astype(jnp.bfloat16)
    out3, res3 = glm_block(h3, c2, s2, p3, cfg2)
    jax.block_until_ready((out3, res3))
    ro3, rr3 = glm_block_ref(h3.astype(jnp.float32), c2, s2,
                             {k: v.astype(jnp.float32) for k, v in p3.items()},
                             cfg2)
    assert out3.dtype == jnp.bfloat16
    assert _max_rel(out3, ro3) < 0.12, _max_rel(out3, ro3)
    assert _max_rel(res3, rr3) < 0.12, _max_rel(res3, rr3)

    print("KERNEL_OK")
</pallas_src>

<mosaic_0001>
module attributes {stable_mosaic.version = 11 : i64} {
  func.func @_rmsnorm_kernel(%arg0: i32, %arg1: memref<8x32xf32, #tpu.memory_space<vmem>>, %arg2: memref<1x32xf32, #tpu.memory_space<vmem>>, %arg3: memref<8x32xf32, #tpu.memory_space<vmem>>) attributes {dimension_semantics = [#tpu.dimension_semantics<parallel>], iteration_bounds = array<i64: 1>, scalar_prefetch = 0 : i64, scratch_operands = 0 : i64, tpu.core_type = #tpu.core_type<tc>, window_params = [{transform_indices = @transform_0, window_bounds = array<i64: 8, 32>}, {pipeline_mode = #tpu.pipeline_mode<synchronous>, transform_indices = @transform_1, window_bounds = array<i64: 1, 32>}, {transform_indices = @transform_2, window_bounds = array<i64: 8, 32>}]} {
    %c0 = arith.constant 0 : index
    %c0_0 = arith.constant 0 : index
    %0 = vector.load %arg1[%c0, %c0_0] : memref<8x32xf32, #tpu.memory_space<vmem>>, vector<8x32xf32>
    %1 = arith.mulf %0, %0 : vector<8x32xf32>
    %cst = arith.constant dense<0.000000e+00> : vector<8xf32>
    %2 = vector.multi_reduction <add>, %1, %cst [1] : vector<8x32xf32> to vector<8xf32>
    %3 = vector.shape_cast %2 : vector<8xf32> to vector<8x1xf32>
    %cst_1 = arith.constant 3.200000e+01 : f32
    %4 = vector.broadcast %cst_1 : f32 to vector<8x1xf32>
    %5 = arith.divf %3, %4 : vector<8x1xf32>
    %cst_2 = arith.constant 9.99999974E-6 : f32
    %6 = vector.broadcast %cst_2 : f32 to vector<8x1xf32>
    %7 = arith.addf %5, %6 : vector<8x1xf32>
    %8 = math.rsqrt %7 : vector<8x1xf32>
    %9 = vector.broadcast %8 : vector<8x1xf32> to vector<8x32xf32>
    %10 = arith.mulf %0, %9 : vector<8x32xf32>
    %c0_3 = arith.constant 0 : index
    %c0_4 = arith.constant 0 : index
    %11 = vector.load %arg2[%c0_3, %c0_4] : memref<1x32xf32, #tpu.memory_space<vmem>>, vector<1x32xf32>
    %12 = vector.broadcast %11 : vector<1x32xf32> to vector<8x32xf32>
    %13 = arith.mulf %10, %12 : vector<8x32xf32>
    %c0_5 = arith.constant 0 : index
    %c0_6 = arith.constant 0 : index
    %14 = vector.load %arg3[%c0_5, %c0_6] : memref<8x32xf32, #tpu.memory_space<vmem>>, vector<8x32xf32>
    tpu.vector_store %arg3[%c0_5, %c0_6], %13 {strides = array<i32>} : memref<8x32xf32, #tpu.memory_space<vmem>>, vector<8x32xf32>,
    return
  }
  func.func @transform_0(%arg0: i32) -> (i32, i32) {
    %c0_i32 = arith.constant 0 : i32
    %c0_i32_0 = arith.constant 0 : i32
    return %arg0, %c0_i32 : i32, i32
  }
  func.func @transform_1(%arg0: i32) -> (i32, i32) {
    %c0_i32 = arith.constant 0 : i32
    %c0_i32_0 = arith.constant 0 : i32
    %c0_i32_1 = arith.constant 0 : i32
    return %c0_i32, %c0_i32_0 : i32, i32
  }
  func.func @transform_2(%arg0: i32) -> (i32, i32) {
    %c0_i32 = arith.constant 0 : i32
    %c0_i32_0 = arith.constant 0 : i32
    return %arg0, %c0_i32 : i32, i32
  }
}

</mosaic_0001>

<bundles_post_ra>
// kernel: tpu_custom_call.1
= control target key start
LH: loop header
LB: loop body
LE: loop exit
PB: predicated region body
PF: predicated region fallthrough
CT: control target
= control target key end

     0   :  { %7 = vsyncpa [#allocation3], 0  ;;  %s156_s0 = inlined_call_operand.hbm [shape: f32[8,32], index: 0, kind: input, shape index: {}]   ;;  %s157_s1 = inlined_call_operand.vmem [shape: f32[1,32], index: 1, kind: input, shape index: {}]   ;;  %s158_s2 = inlined_call_operand.hbm [shape: f32[8,32], index: 2, kind: output, shape index: {}]  }
   0x1   :  { %8 = vsyncpa [#allocation4], 0  ;;  %s112_s9 = smov [#allocation2]   ;;  %s64_s13 = scalar_lea.hbm %s156_s0, 128 }
   0x2   :  { %s15_s10 = sshll.u32 %s112_s9, 4  ;;  %p65_p0 = scmp.ne.s32.totalorder %s156_s0, %s64_s13  ;;  %s16_s10 = int_to_ptr.vmem [resolvable:$true] %s15_s10 }
   0x3   :  { %p68_p1 = scmp.lt.u32.totalorder %s64_s13, %s156_s0 }
   0x5   :  { %p70_p2 = pnand %p68_p1, %p65_p0 }
   0x7   :  { %73 = shalt.err (!%p70_p2)
}
   0x8   :  { %s74_s18 = scalar_lea.vmem %s16_s10, 128  ;;  %p79_p4 = scmp.lt.s32.totalorder %s16_s10, %s16_s10 }
   0x9   :  { %p75_p3 = scmp.ne.s32.totalorder %s16_s10, %s74_s18  ;;  %p80_p5 = scmp.lt.s32.totalorder %s74_s18, %s74_s18 }
   0xb   :  { %p81_p6 = por %p80_p5, %p79_p4 }
   0xd   :  { %p82_p7 = pnand %p81_p6, %p75_p3 }
   0xf   :  { %85 = shalt.err (!%p82_p7)
}
  0x10   :  { %18 = dma.hbm_to_vmem [thread:$0]  %s156_s0, 128, %s16_s10, [#allocation3]  }
  0x11   :  { %108 = dma.done.wait [#allocation3], 128  }
  0x12   :  { %109 = vsyncadd [#allocation3], 4294967168  ;;  %v24_v0 = vld [vmem:[#allocation2] sm:$0xff]  ;;  %vm26_vm0 = vcmask 261120   ;;  %s113_s23 = smov [#allocation5]  }
  0x13   :  { %v25_v1 = vmul.f32 %v24_v0, %v24_v0  ;;  %v59_v7 = vld [vmem:[%s157_s1] ss:$0 sm:$0xff]  ;;  %s50_s24 = sshll.u32 %s113_s23, 4  ;;  %s51_s24 = int_to_ptr.vmem [resolvable:$true] %s50_s24 }
  0x14   :  { %s86_s0 = scalar_lea.vmem %s51_s24, 128  ;;  %p91_p9 = scmp.lt.s32.totalorder %s51_s24, %s51_s24 }
  0x15   :  { %v27_v2 = vsel %vm26_vm0, %v25_v1, 0.0  ;;  %p87_p8 = scmp.ne.s32.totalorder %s51_s24, %s86_s0  ;;  %p92_p10 = scmp.lt.s32.totalorder %s86_s0, %s86_s0 }
  0x16   :  { %28 = vadd.xlane.f32.xlu0 %v27_v2 }
  0x17   :  { %p93_p11 = por %p92_p10, %p91_p9 }
  0x19   :  { %p94_p12 = pnand %p93_p11, %p87_p8 }
  0xa3   :  { %v29_v3 = vpop.xlane.xlu0 %28 }
  0xa4   :  { %v31_v4 = vmul.f32 0.03125, %v29_v3 }
  0xa6   :  { %v32_v5 = vadd.f32 1e-05, %v31_v4 }
  0xa8   :  { %62 = vrsqrt.f32 %v32_v5 }
  0xb2   :  { %v63_v6 = vpop.eup %62 }
  0xb3   :  { %v34_v8 = vmul.f32 %v63_v6, %v24_v0 }
  0xb5   :  { %v42_v9 = vmul.f32 %v59_v7, %v34_v8 }
  0xb7   :  { %43 = vst.msk [vmem:[#allocation5] sm:$0xff] %vm26_vm0, %v42_v9 }
  0xb8   :  { %97 = shalt.err (!%p94_p12)
}
  0xb9   :  { %s98_s27 = scalar_lea.hbm %s158_s2, 128 }
  0xba   :  { %p99_p13 = scmp.ne.s32.totalorder %s158_s2, %s98_s27  ;;  %p102_p0 = scmp.lt.u32.totalorder %s98_s27, %s158_s2 }
  0xbc   :  { %p104_p1 = pnand %p102_p0, %p99_p13 }
  0xbe   :  { %107 = shalt.err (!%p104_p1)
}
  0xbf   :  { %53 = dma.vmem_to_hbm [thread:$0]  %s51_s24, 128, %s158_s2, [#allocation4]  }
  0xc0   :  { %110 = dma.done.wait [#allocation4], 128  }
  0xc1   :  { %111 = vsyncadd [#allocation4], 4294967168 }
  0xc2   :  { %57 = vsyncpa [#allocation3], 1 }
  0xc3   :  { %58 = vsyncpa [#allocation4], 1 }

</bundles_post_ra>
